<compile_context>
chip_gen: v7x
topology: tpu7x:2x2x1
jax: 0.10.0
libtpu: 0.0.40
codegen_flags: <defaults>
</compile_context>

<pallas_src>
import functools

import jax
import jax.numpy as jnp
from jax.experimental import pallas as pl
from jax.experimental.pallas import tpu as pltpu


def _tprelu_kernel(x_ref, w_ref, b_ref, o_ref):
    # w/b: (tile_r, 1) float32, weight already clamped to [0, 1] in the wrapper.
    x = x_ref[...].astype(jnp.float32)          # (tile_r, tile_c)
    w = w_ref[...]                              # (tile_r, 1)
    b = b_ref[...]                              # (tile_r, 1)
    shifted = x - b
    # PReLU(x - b, w) + b  ==  where(x - b > 0, x, w*(x - b) + b)
    o_ref[...] = jnp.where(shifted > 0, x, w * shifted + b).astype(o_ref.dtype)


def _tpu_budget():
    """Returns (target bytes per x/out block, vmem_limit_bytes, multi_core)."""
    try:
        vmem = pltpu.get_tpu_info().vmem_capacity_bytes
    except Exception:
        vmem = 64 * 1024 * 1024
    if vmem >= 100 * 1024 * 1024:
        # v5e / v6e: 128 MiB physical VMEM, 1 TensorCore.
        return 8 << 20, 64 << 20, False
    # v7x: 64 MiB per-TC VMEM, 2 TensorCores -> smaller blocks, default limit.
    return 4 << 20, 32 << 20, True


def _sublane(itemsize):
    return {4: 8, 2: 16, 1: 32}.get(itemsize, 8)


def _choose_tiles(R, HW, itemsize, target_block_bytes, multi_core):
    sub = _sublane(itemsize)

    # Column tile: full extent for moderate HW (exempt from the 128 rule),
    # otherwise a multiple of 128; the single ragged edge block is masked.
    tile_c = HW if HW <= 4096 else 4096

    rows = max(sub, (target_block_bytes // (tile_c * itemsize)) // sub * sub)
    if rows >= R:
        rows = R                                  # full-extent: always legal
    n_col_blocks = pl.cdiv(HW, tile_c)
    # Only shrink rows to get >= 2 row blocks on multi-TC chips (v7x) when the
    # column axis can't already be sharded across cores.
    if multi_core and n_col_blocks < 2 and pl.cdiv(R, rows) < 2 and R >= 2 * sub:
        rows = max(sub, ((R // 2) // sub) * sub)
    return rows, tile_c


def _normalize_tiles(tile_r, tile_c, R, HW, itemsize):
    """Round user-supplied tiles to layout-legal sizes."""
    sub = _sublane(itemsize)
    tile_r = R if tile_r >= R else max(sub, (tile_r // sub) * sub)
    tile_c = HW if tile_c >= HW else max(128, (tile_c // 128) * 128)
    return tile_r, tile_c


@functools.partial(jax.jit, static_argnames=("tile_r", "tile_c"))
def tprelu(x_nchw, weight, bias, *, tile_r=None, tile_c=None):
    """x_nchw: (N, C, *spatial); weight, bias: (C,) or (1,)."""
    N, C = x_nchw.shape[0], x_nchw.shape[1]
    HW = 1
    for s in x_nchw.shape[2:]:
        HW *= s
    R = N * C
    dtype = x_nchw.dtype
    itemsize = jnp.dtype(dtype).itemsize

    target, vmem_limit, multi_core = _tpu_budget()
    auto_r, auto_c = _choose_tiles(R, HW, itemsize, target, multi_core)
    tile_r = auto_r if tile_r is None else tile_r
    tile_c = auto_c if tile_c is None else tile_c
    tile_r, tile_c = _normalize_tiles(tile_r, tile_c, R, HW, itemsize)

    x2d = x_nchw.reshape(R, HW)

    # Per-row params (row n*C + c -> channel c), kept in f32 like PyTorch.
    # clamp(weight, 0, 1) is hoisted here (tiny per-channel op).
    w_c = jnp.asarray(weight, jnp.float32).reshape(-1)
    b_c = jnp.asarray(bias, jnp.float32).reshape(-1)
    if w_c.shape[0] == 1 and C != 1:            # num_parameters == 1 broadcast
        w_c = jnp.broadcast_to(w_c, (C,))
        b_c = jnp.broadcast_to(b_c, (C,))
    w_rows = jnp.clip(jnp.tile(w_c, (N,)), 0.0, 1.0).reshape(R, 1)
    b_rows = jnp.tile(b_c, (N,)).reshape(R, 1)

    n_row_blocks = pl.cdiv(R, tile_r)
    n_col_blocks = pl.cdiv(HW, tile_c)

    cost = pl.CostEstimate(
        flops=4 * R * HW,
        transcendentals=0,
        bytes_accessed=2 * R * HW * itemsize + 2 * R * 4,
    )

    out2d = pl.pallas_call(
        _tprelu_kernel,
        out_shape=jax.ShapeDtypeStruct((R, HW), dtype),
        grid_spec=pltpu.PrefetchScalarGridSpec(
            num_scalar_prefetch=0,
            grid=(n_row_blocks, n_col_blocks),
            in_specs=[
                pl.BlockSpec((tile_r, tile_c), lambda i, j: (i, j)),
                # Params: per-row-block; block index depends only on i, so the
                # DMA is elided while the inner column axis advances.
                pl.BlockSpec((tile_r, 1), lambda i, j: (i, 0)),
                pl.BlockSpec((tile_r, 1), lambda i, j: (i, 0)),
            ],
            out_specs=pl.BlockSpec((tile_r, tile_c), lambda i, j: (i, j)),
        ),
        compiler_params=pltpu.CompilerParams(
            dimension_semantics=("parallel", "parallel"),
            vmem_limit_bytes=vmem_limit,
        ),
        cost_estimate=cost,
    )(x2d, w_rows, b_rows)

    return out2d.reshape(x_nchw.shape)


def tprelu_ref(x_nchw, weight, bias):
    """Pure-JAX reference of the PyTorch forward."""
    C = x_nchw.shape[1]
    w = jnp.asarray(weight, jnp.float32).reshape(-1)
    b = jnp.asarray(bias, jnp.float32).reshape(-1)
    if w.shape[0] == 1 and C != 1:
        w = jnp.broadcast_to(w, (C,))
        b = jnp.broadcast_to(b, (C,))
    bc = (1, C) + (1,) * (x_nchw.ndim - 2)
    b = b.reshape(bc)
    w = jnp.clip(w, 0.0, 1.0).reshape(bc)
    shifted = x_nchw.astype(jnp.float32) - b
    return (jnp.maximum(shifted, 0.0) + w * jnp.minimum(shifted, 0.0) + b).astype(
        x_nchw.dtype)


if __name__ == "__main__":
    key = jax.random.PRNGKey(0)
    N, C, H, W = 2, 4, 16, 16
    kx, kw, kb = jax.random.split(key, 3)
    x = jax.random.normal(kx, (N, C, H, W), dtype=jnp.float32)

    # Module init is weight=0.25, bias=0; perturb so clamp/bias paths are hit.
    weight = jnp.full((C,), 0.25, jnp.float32) \
        + 0.9 * jax.random.normal(kw, (C,), jnp.float32)
    bias = 0.5 * jax.random.normal(kb, (C,), jnp.float32)

    out = jax.block_until_ready(tprelu(x, weight, bias))
    ref = tprelu_ref(x, weight, bias)
    assert out.shape == x.shape
    assert jnp.allclose(out, ref, atol=1e-6, rtol=1e-6), "mismatch vs reference"

    # Non-128-aligned spatial shape: handled in-kernel (no HBM pad/slice).
    x2 = jax.random.normal(jax.random.PRNGKey(1), (4, 8, 30, 30), jnp.float32)
    w2 = jnp.linspace(-0.5, 1.5, 8, dtype=jnp.float32)
    b2 = jnp.linspace(-0.3, 0.3, 8, dtype=jnp.float32)
    out2 = jax.block_until_ready(tprelu(x2, w2, b2))
    assert jnp.allclose(out2, tprelu_ref(x2, w2, b2), atol=1e-6, rtol=1e-6)

    # bf16 input with f32 params (kernel computes in f32, casts on store).
    xb = x.astype(jnp.bfloat16)
    outb = jax.block_until_ready(tprelu(xb, weight, bias))
    refb = tprelu_ref(xb, weight, bias)
    assert outb.dtype == jnp.bfloat16
    assert jnp.allclose(outb.astype(jnp.float32), refb.astype(jnp.float32),
                        atol=2e-2, rtol=2e-2)

    print("KERNEL_OK")
</pallas_src>

<mosaic_0001>
module attributes {stable_mosaic.version = 11 : i64} {
  func.func @_tprelu_kernel(%arg0: i32, %arg1: i32, %arg2: memref<8x256xf32, #tpu.memory_space<vmem>>, %arg3: memref<8x1xf32, #tpu.memory_space<vmem>>, %arg4: memref<8x1xf32, #tpu.memory_space<vmem>>, %arg5: memref<8x256xf32, #tpu.memory_space<vmem>>) attributes {dimension_semantics = [#tpu.dimension_semantics<parallel>, #tpu.dimension_semantics<parallel>], iteration_bounds = array<i64: 1, 1>, scalar_prefetch = 0 : i64, scratch_operands = 0 : i64, tpu.core_type = #tpu.core_type<tc>, window_params = [{transform_indices = @transform_0, window_bounds = array<i64: 8, 256>}, {transform_indices = @transform_1, window_bounds = array<i64: 8, 1>}, {transform_indices = @transform_2, window_bounds = array<i64: 8, 1>}, {transform_indices = @transform_3, window_bounds = array<i64: 8, 256>}]} {
    %c0 = arith.constant 0 : index
    %c0_0 = arith.constant 0 : index
    %0 = vector.load %arg2[%c0, %c0_0] : memref<8x256xf32, #tpu.memory_space<vmem>>, vector<8x256xf32>
    %c0_1 = arith.constant 0 : index
    %c0_2 = arith.constant 0 : index
    %1 = vector.load %arg3[%c0_1, %c0_2] : memref<8x1xf32, #tpu.memory_space<vmem>>, vector<8x1xf32>
    %c0_3 = arith.constant 0 : index
    %c0_4 = arith.constant 0 : index
    %2 = vector.load %arg4[%c0_3, %c0_4] : memref<8x1xf32, #tpu.memory_space<vmem>>, vector<8x1xf32>
    %3 = vector.broadcast %2 : vector<8x1xf32> to vector<8x256xf32>
    %4 = arith.subf %0, %3 : vector<8x256xf32>
    %cst = arith.constant 0.000000e+00 : f32
    %5 = vector.broadcast %cst : f32 to vector<8x256xf32>
    %6 = arith.cmpf ogt, %4, %5 : vector<8x256xf32>
    %7 = vector.broadcast %1 : vector<8x1xf32> to vector<8x256xf32>
    %8 = arith.mulf %7, %4 : vector<8x256xf32>
    %9 = vector.broadcast %2 : vector<8x1xf32> to vector<8x256xf32>
    %10 = arith.addf %8, %9 : vector<8x256xf32>
    %11 = arith.select %6, %0, %10 : vector<8x256xi1>, vector<8x256xf32>
    %c0_5 = arith.constant 0 : index
    %c0_6 = arith.constant 0 : index
    %12 = vector.load %arg5[%c0_5, %c0_6] : memref<8x256xf32, #tpu.memory_space<vmem>>, vector<8x256xf32>
    tpu.vector_store %arg5[%c0_5, %c0_6], %11 {strides = array<i32>} : memref<8x256xf32, #tpu.memory_space<vmem>>, vector<8x256xf32>,
    return
  }
  func.func @transform_0(%arg0: i32, %arg1: i32) -> (i32, i32) {
    %c0_i32 = arith.constant 0 : i32
    return %arg0, %arg1 : i32, i32
  }
  func.func @transform_1(%arg0: i32, %arg1: i32) -> (i32, i32) {
    %c0_i32 = arith.constant 0 : i32
    %c0_i32_0 = arith.constant 0 : i32
    return %arg0, %c0_i32 : i32, i32
  }
  func.func @transform_2(%arg0: i32, %arg1: i32) -> (i32, i32) {
    %c0_i32 = arith.constant 0 : i32
    %c0_i32_0 = arith.constant 0 : i32
    return %arg0, %c0_i32 : i32, i32
  }
  func.func @transform_3(%arg0: i32, %arg1: i32) -> (i32, i32) {
    %c0_i32 = arith.constant 0 : i32
    return %arg0, %arg1 : i32, i32
  }
}

</mosaic_0001>

<bundles_post_ra>
// kernel: tile.0
= control target key start
LH: loop header
LB: loop body
LE: loop exit
PB: predicated region body
PF: predicated region fallthrough
CT: control target
= control target key end

     0   :  { %s34_s8 = smov 125   ;;  %vm7_vm0 = vcmask 7168   ;;  %s35_s11 = smov 126   ;;  %s61_s0 = inlined_call_operand.vmem [shape: f32[2,4], index: 0, kind: input, shape index: {}]   ;;  %s62_s1 = inlined_call_operand.vmem [shape: f32[8,1], index: 1, kind: output, shape index: {}]  }
   0x1   :  { %v4_v0 = vld [vmem:[%s61_s0] sm:$0x3]  ;;  %s33_s0 = smov 127  }
   0x2   :  { %5 = vst [vmem:[#allocation0] sm:$0x3] %v4_v0 }
   0x9   :  { %v9_v1 = vld [vmem:[#allocation0] sm:$0x3]  }
   0xa   :  { %v21_v2 = vld [vmem:[#allocation0] sm:$0x3]   ;;  %10 = vrot.lane.b32.xlu0 %v9_v1, %s33_s0 }
   0xb   :  { %22 = vrot.lane.b32.xlu1 %v21_v2, %s34_s8  ;;  %v6_v3 = vld [vmem:[#allocation0] sm:$0x3]  }
   0xc   :  { %v15_v4 = vld [vmem:[#allocation0] sm:$0x3]   ;;  %8 = vst.msk [vmem:[%s62_s1] ss:$4 sm:$0x3] %vm7_vm0, %v6_v3  }
   0xe   :  { %16 = vrot.lane.b32.xlu0 %v15_v4, %s35_s11 }
  0x7c   :  { %v11_v5 = vpop.permute.xlu0 %10  }
  0x7d   :  { %v23_v6 = vpop.permute.xlu1 %22   ;;  %27 = vst.msk [vmem:[%s62_s1 + $0x1] ss:$4 sm:$0x3] %vm7_vm0, %v11_v5  }
  0x7e   :  { %29 = vst.msk [vmem:[%s62_s1 + $0x3] ss:$4 sm:$0x3] %vm7_vm0, %v23_v6  }
  0x80   :  { %v17_v7 = vpop.permute.xlu0 %16  }
  0x81   :  { %28 = vst.msk [vmem:[%s62_s1 + $0x2] ss:$4 sm:$0x3] %vm7_vm0, %v17_v7  }

// kernel: tprelu.1
= control target key start
LH: loop header
LB: loop body
LE: loop exit
PB: predicated region body
PF: predicated region fallthrough
CT: control target
= control target key end

     0   :  { %v46_v0 = vmov 0   ;;  %s85_s2 = inlined_call_operand.vmem [shape: f32[8,1], index: 2, kind: input, shape index: {}]   ;;  %s86_s1 = inlined_call_operand.vmem [shape: f32[8,1], index: 1, kind: input, shape index: {}]   ;;  %s87_s0 = inlined_call_operand.vmem [shape: f32[8,256], index: 0, kind: input, shape index: {}]   ;;  %s88_s3 = inlined_call_operand.vmem [shape: f32[8,256], index: 3, kind: output, shape index: {}]  }
   0x1   :  { %45 = vset.pattern.permute.xlu0 %v46_v0  ;;  %v17_v1 = vld [vmem:[%s85_s2] sm:$0xff]  ;;  %v15_v5 = vld [vmem:[%s87_s0 + $0x8] sm:$0xff] }
   0x2   :  { %20 = vperm.xlu0 %45, %v17_v1   ;;  %v16_v2 = vld [vmem:[%s86_s1] sm:$0xff] }
   0x3   :  { %v14_v4 = vld [vmem:[%s87_s0] sm:$0xff] }
   0x6   :  { %29 = vperm.xlu0 %45, %v16_v2  }
  0x81   :  { %v21_v3 = vpop.permute.xlu0 %20 }
  0x82   :  { %v23_v6 = vsub.f32 %v14_v4, %v21_v3  ;;  %v24_v7 = vsub.f32 %v15_v5, %v21_v3 }
  0x84   :  { %vm25_vm0 = vcmp.gt.f32.partialorder %v23_v6, 0.0  ;;  %vm26_vm1 = vcmp.gt.f32.partialorder %v24_v7, 0.0 }
  0x85   :  { %v30_v8 = vpop.permute.xlu0 %29 }
  0x86   :  { %v32_v9 = vmul.f32 %v30_v8, %v23_v6  ;;  %v33_v10 = vmul.f32 %v30_v8, %v24_v7 }
  0x88   :  { %v34_v11 = vadd.f32 %v32_v9, %v21_v3  ;;  %v35_v12 = vadd.f32 %v33_v10, %v21_v3 }
  0x8a   :  { %v36_v13 = vsel %vm25_vm0, %v14_v4, %v34_v11  ;;  %v37_v14 = vsel %vm26_vm1, %v15_v5, %v35_v12 }
  0x8b   :  { %38 = vst [vmem:[%s88_s3] sm:$0xff] %v36_v13  ;;  %39 = vst [vmem:[%s88_s3 + $0x8] sm:$0xff] %v37_v14 }

</bundles_post_ra>
